<compile_context>
chip_gen: v7x
topology: tpu7x:2x2x1
jax: 0.10.0
libtpu: 0.0.40
codegen_flags: <defaults>
</compile_context>

<pallas_src>
import functools

import jax
import jax.numpy as jnp
from jax.experimental import pallas as pl
from jax.experimental.pallas import tpu as pltpu


# ----------------------------- Pallas kernel ------------------------------ #
def _make_neucf_kernel(num_layers: int):
    """Builds a kernel with a fixed number of MLP layers (closure over it)."""

    def kernel(*refs):
        # refs layout:
        #   [u_gmf, i_gmf, u_mlp, i_mlp,
        #    W0_top, W0_bot, b0,
        #    W_1, b_1, ..., W_{L-1}, b_{L-1},
        #    Wp_gmf (8, rank), Wp_mlp (8, rank), b_pred (1, 1),
        #    out]
        u_gmf_ref, i_gmf_ref, u_mlp_ref, i_mlp_ref = refs[:4]
        p = refs[4:-1]
        out_ref = refs[-1]

        # ---- MLP layer 0: split matmul replaces concat(u_mlp, i_mlp) @ W0 ----
        w0_top, w0_bot, b0 = p[0], p[1], p[2]
        x = jnp.dot(u_mlp_ref[...], w0_top[...], preferred_element_type=jnp.float32)
        x = x + jnp.dot(i_mlp_ref[...], w0_bot[...], preferred_element_type=jnp.float32)
        x = jnp.maximum(x + b0[...], 0.0).astype(jnp.bfloat16)   # ReLU, back to bf16

        # ---- Remaining MLP layers: Linear -> ReLU (bf16 MXU, f32 accumulate) ----
        for l in range(1, num_layers):
            w = p[3 + 2 * (l - 1)][...]                          # (in_l, out_l) bf16
            b = p[4 + 2 * (l - 1)][...]                          # (1, out_l)   f32
            y = jnp.dot(x, w, preferred_element_type=jnp.float32) + b
            x = jnp.maximum(y, 0.0).astype(jnp.bfloat16)

        # ---- GMF tower: elementwise product of user/item GMF embeddings ----
        gmf = u_gmf_ref[...] * i_gmf_ref[...]                    # (tile_b, rank) bf16

        # ---- Prediction head: two tiny trans-RHS dot_generals producing a
        #      lane-dense (8, tile_b) block (rows replicated). No concat, no
        #      lane-width-1 store, no relayout. ----
        w_pg = p[3 + 2 * (num_layers - 1)][...]                  # (8, rank) bf16
        w_pm = p[4 + 2 * (num_layers - 1)][...]                  # (8, rank) bf16
        b_p = p[5 + 2 * (num_layers - 1)][...]                   # (1, 1)    f32

        trans_rhs = (((1,), (1,)), ((), ()))                     # contract last dims
        head = (
            jax.lax.dot_general(w_pg, gmf, trans_rhs,
                                preferred_element_type=jnp.float32)
            + jax.lax.dot_general(w_pm, x, trans_rhs,
                                  preferred_element_type=jnp.float32)
            + b_p
        )
        out_ref[...] = head                                      # (8, tile_b) f32

    return kernel


# ------------------------------ tile selection ----------------------------- #
def _choose_tile(batch: int, tile_b: int):
    """Pick the batch tile: big (amortize per-step overhead) but not bigger than
    the batch, and >=2 tiles when possible (v7x dual TensorCore sharding)."""
    b128 = ((batch + 127) // 128) * 128
    tb = max(128, (min(tile_b, b128) // 128) * 128)
    if b128 >= 2 * 128 and pl.cdiv(b128, tb) < 2:
        tb = max(128, ((b128 // 2 + 127) // 128) * 128)
    n_tiles = pl.cdiv(b128, tb)
    return tb, n_tiles


# ------------------------------- wrapper ----------------------------------- #
def neucf_forward(user_idx, serv_idx, params, *, rank, num_layers, tile_b=1024):
    """Embedding gathers (plain JAX) + one gridded Pallas call for the math."""
    dim_mlp = rank * 2 ** (num_layers - 1)
    cdt = jnp.bfloat16   # compute dtype for activations & matmul weights

    # Embedding lookups (gathers) — plain JAX glue. Cast tables before the
    # take so the gathered HBM copies (re-read by the kernel) are bf16.
    u_gmf = jnp.take(params["embed_user_GMF"].astype(cdt), user_idx, axis=0)
    i_gmf = jnp.take(params["embed_item_GMF"].astype(cdt), serv_idx, axis=0)
    u_mlp = jnp.take(params["embed_user_MLP"].astype(cdt), user_idx, axis=0)
    i_mlp = jnp.take(params["embed_item_MLP"].astype(cdt), serv_idx, axis=0)

    batch = user_idx.shape[0]
    tile_b, n_tiles = _choose_tile(batch, tile_b)
    b_pad = n_tiles * tile_b
    pad = b_pad - batch
    if pad:
        u_gmf = jnp.pad(u_gmf, ((0, pad), (0, 0)))
        i_gmf = jnp.pad(i_gmf, ((0, pad), (0, 0)))
        u_mlp = jnp.pad(u_mlp, ((0, pad), (0, 0)))
        i_mlp = jnp.pad(i_mlp, ((0, pad), (0, 0)))

    # Split the first MLP weight (top/bottom halves of the concat input) and
    # the prediction weight (gmf half / mlp half). The head weights are
    # replicated to 8 rows so the head dot_generals produce a full-sublane
    # (8, tile_b) block directly.
    w0 = params["mlp_W"][0].astype(cdt)               # (2*dim_mlp, out0)
    w0_top, w0_bot = w0[:dim_mlp], w0[dim_mlp:]
    wp = params["pred_W"]                              # (2*rank, 1) f32
    w_pg = jnp.tile(wp[:rank].T, (8, 1)).astype(cdt)   # (8, rank) — GMF half
    w_pm = jnp.tile(wp[rank:].T, (8, 1)).astype(cdt)   # (8, rank) — MLP half

    kernel_inputs = [u_gmf, i_gmf, u_mlp, i_mlp,
                     w0_top, w0_bot, params["mlp_b"][0]]
    for l in range(1, num_layers):
        kernel_inputs.append(params["mlp_W"][l].astype(cdt))   # (in_l, out_l)
        kernel_inputs.append(params["mlp_b"][l])               # (1, out_l) f32
    kernel_inputs += [w_pg, w_pm, params["pred_b"]]

    def act_spec(feat):
        # Batch-tiled activation: new block each grid step (pipelined DMA).
        return pl.BlockSpec((tile_b, feat), lambda i: (i, 0))

    def const_spec(arr):
        # Weights/biases: constant block index -> DMA'd once, stays resident.
        return pl.BlockSpec(arr.shape, lambda i: (0, 0))

    in_specs = [act_spec(rank), act_spec(rank), act_spec(dim_mlp), act_spec(dim_mlp)]
    in_specs += [const_spec(a) for a in kernel_inputs[4:]]

    # Advisory cost estimate so XLA schedules the custom call sensibly.
    flops = 0
    in_l = 2 * dim_mlp
    for _ in range(num_layers):
        flops += 2 * b_pad * in_l * (in_l // 2)
        in_l //= 2
    flops += b_pad * rank + 2 * 8 * b_pad * 2 * rank          # GMF product + head
    weight_bytes = sum(int(a.size) * a.dtype.itemsize for a in kernel_inputs[4:])
    bytes_accessed = (b_pad * (2 * rank + 2 * dim_mlp) * 2    # bf16 activations
                      + 8 * b_pad * 4                         # f32 output
                      + weight_bytes)

    out = pl.pallas_call(
        _make_neucf_kernel(num_layers),
        out_shape=jax.ShapeDtypeStruct((8, b_pad), jnp.float32),
        grid_spec=pltpu.PrefetchScalarGridSpec(
            num_scalar_prefetch=0,
            grid=(n_tiles,),
            in_specs=in_specs,
            out_specs=pl.BlockSpec((8, tile_b), lambda i: (0, i)),
        ),
        compiler_params=pltpu.CompilerParams(
            dimension_semantics=("parallel",),
        ),
        cost_estimate=pl.CostEstimate(
            flops=flops, transcendentals=0, bytes_accessed=bytes_accessed
        ),
    )(*kernel_inputs)

    # Row 0 holds the predictions (rows are replicated); drop batch padding.
    return out[0, :batch]


# --------------------------- parameter creation ---------------------------- #
def init_params(key, *, rank, num_layers):
    dim_gmf = rank
    dim_mlp = rank * 2 ** (num_layers - 1)
    keys = jax.random.split(key, 6 + 2 * num_layers)

    params = {
        "embed_user_GMF": jax.random.normal(keys[0], (339, dim_gmf), jnp.float32) * 0.1,
        "embed_user_MLP": jax.random.normal(keys[1], (399, dim_mlp), jnp.float32) * 0.1,
        "embed_item_GMF": jax.random.normal(keys[2], (5825, dim_gmf), jnp.float32) * 0.1,
        "embed_item_MLP": jax.random.normal(keys[3], (5825, dim_mlp), jnp.float32) * 0.1,
        "mlp_W": [],
        "mlp_b": [],
    }
    # MLP layers: Linear(rank*2^(L-i) -> rank*2^(L-i)/2).  PyTorch stores W as
    # (out, in); we store the transposed (in, out) so the kernel does x @ W.
    for i in range(num_layers):
        in_size = rank * 2 ** (num_layers - i)
        out_size = in_size // 2
        w = jax.random.normal(keys[4 + 2 * i], (in_size, out_size), jnp.float32) * 0.05
        b = jax.random.normal(keys[5 + 2 * i], (1, out_size), jnp.float32) * 0.05
        params["mlp_W"].append(w)
        params["mlp_b"].append(b)

    params["pred_W"] = (
        jax.random.normal(keys[4 + 2 * num_layers], (rank * 2, 1), jnp.float32) * 0.05
    )
    params["pred_b"] = (
        jax.random.normal(keys[5 + 2 * num_layers], (1, 1), jnp.float32) * 0.05
    )
    return params


# ----------------------------- pure-JAX reference -------------------------- #
def neucf_reference(user_idx, serv_idx, params, *, rank, num_layers):
    u_gmf = params["embed_user_GMF"][user_idx]
    i_gmf = params["embed_item_GMF"][serv_idx]
    u_mlp = params["embed_user_MLP"][user_idx]
    i_mlp = params["embed_item_MLP"][serv_idx]
    x = jnp.concatenate([u_mlp, i_mlp], axis=-1)
    for l in range(num_layers):
        x = jnp.maximum(x @ params["mlp_W"][l] + params["mlp_b"][l], 0.0)
    feat = jnp.concatenate([u_gmf * i_gmf, x], axis=-1)
    return (feat @ params["pred_W"] + params["pred_b"]).reshape(-1)


# ----------------------------------- main ----------------------------------- #
if __name__ == "__main__":
    rank = 32
    num_layers = 3
    batch = 8

    key = jax.random.PRNGKey(0)
    k_params, k_user, k_item = jax.random.split(key, 3)

    params = init_params(k_params, rank=rank, num_layers=num_layers)
    user_idx = jax.random.randint(k_user, (batch,), 0, 339, dtype=jnp.int32)
    serv_idx = jax.random.randint(k_item, (batch,), 0, 5825, dtype=jnp.int32)

    fwd = functools.partial(neucf_forward, rank=rank, num_layers=num_layers)
    pred = jax.block_until_ready(jax.jit(fwd)(user_idx, serv_idx, params))

    ref = neucf_reference(user_idx, serv_idx, params, rank=rank, num_layers=num_layers)
    assert pred.shape == (batch,)
    # bf16 activations/weights with f32 accumulation -> relaxed tolerance vs f32 ref.
    assert jnp.allclose(pred, ref, atol=2e-2, rtol=2e-2), (pred, ref)

    print("KERNEL_OK")
</pallas_src>

<mosaic_0001>
module attributes {stable_mosaic.version = 11 : i64} {
  func.func @kernel(%arg0: i32, %arg1: memref<128x32xbf16, #tpu.memory_space<vmem>>, %arg2: memref<128x32xbf16, #tpu.memory_space<vmem>>, %arg3: memref<128x128xbf16, #tpu.memory_space<vmem>>, %arg4: memref<128x128xbf16, #tpu.memory_space<vmem>>, %arg5: memref<128x128xbf16, #tpu.memory_space<vmem>>, %arg6: memref<128x128xbf16, #tpu.memory_space<vmem>>, %arg7: memref<1x128xf32, #tpu.memory_space<vmem>>, %arg8: memref<128x64xbf16, #tpu.memory_space<vmem>>, %arg9: memref<1x64xf32, #tpu.memory_space<vmem>>, %arg10: memref<64x32xbf16, #tpu.memory_space<vmem>>, %arg11: memref<1x32xf32, #tpu.memory_space<vmem>>, %arg12: memref<8x32xbf16, #tpu.memory_space<vmem>>, %arg13: memref<8x32xbf16, #tpu.memory_space<vmem>>, %arg14: memref<1x1xf32, #tpu.memory_space<vmem>>, %arg15: memref<8x128xf32, #tpu.memory_space<vmem>>) attributes {dimension_semantics = [#tpu.dimension_semantics<parallel>], iteration_bounds = array<i64: 1>, scalar_prefetch = 0 : i64, scratch_operands = 0 : i64, tpu.core_type = #tpu.core_type<tc>, window_params = [{transform_indices = @transform_0, window_bounds = array<i64: 128, 32>}, {transform_indices = @transform_1, window_bounds = array<i64: 128, 32>}, {transform_indices = @transform_2, window_bounds = array<i64: 128, 128>}, {transform_indices = @transform_3, window_bounds = array<i64: 128, 128>}, {pipeline_mode = #tpu.pipeline_mode<synchronous>, transform_indices = @transform_4, window_bounds = array<i64: 128, 128>}, {pipeline_mode = #tpu.pipeline_mode<synchronous>, transform_indices = @transform_5, window_bounds = array<i64: 128, 128>}, {pipeline_mode = #tpu.pipeline_mode<synchronous>, transform_indices = @transform_6, window_bounds = array<i64: 1, 128>}, {pipeline_mode = #tpu.pipeline_mode<synchronous>, transform_indices = @transform_7, window_bounds = array<i64: 128, 64>}, {pipeline_mode = #tpu.pipeline_mode<synchronous>, transform_indices = @transform_8, window_bounds = array<i64: 1, 64>}, {pipeline_mode = #tpu.pipeline_mode<synchronous>, transform_indices = @transform_9, window_bounds = array<i64: 64, 32>}, {pipeline_mode = #tpu.pipeline_mode<synchronous>, transform_indices = @transform_10, window_bounds = array<i64: 1, 32>}, {pipeline_mode = #tpu.pipeline_mode<synchronous>, transform_indices = @transform_11, window_bounds = array<i64: 8, 32>}, {pipeline_mode = #tpu.pipeline_mode<synchronous>, transform_indices = @transform_12, window_bounds = array<i64: 8, 32>}, {pipeline_mode = #tpu.pipeline_mode<synchronous>, transform_indices = @transform_13, window_bounds = array<i64: 1, 1>}, {transform_indices = @transform_14, window_bounds = array<i64: 8, 128>}]} {
    %c0 = arith.constant 0 : index
    %c0_0 = arith.constant 0 : index
    %0 = vector.load %arg3[%c0, %c0_0] : memref<128x128xbf16, #tpu.memory_space<vmem>>, vector<128x128xbf16>
    %c0_1 = arith.constant 0 : index
    %c0_2 = arith.constant 0 : index
    %1 = vector.load %arg5[%c0_1, %c0_2] : memref<128x128xbf16, #tpu.memory_space<vmem>>, vector<128x128xbf16>
    %cst = arith.constant dense<0.000000e+00> : vector<128x128xf32>
    %2 = tpu.matmul %0, %1, %cst {dimension_numbers = #tpu.dot_dimension_numbers<[1], [0], [0], [1], [0, 0, 1, 1], [], []>} : vector<128x128xbf16>, vector<128x128xbf16>, vector<128x128xf32> -> vector<128x128xf32>
    %c0_3 = arith.constant 0 : index
    %c0_4 = arith.constant 0 : index
    %3 = vector.load %arg4[%c0_3, %c0_4] : memref<128x128xbf16, #tpu.memory_space<vmem>>, vector<128x128xbf16>
    %c0_5 = arith.constant 0 : index
    %c0_6 = arith.constant 0 : index
    %4 = vector.load %arg6[%c0_5, %c0_6] : memref<128x128xbf16, #tpu.memory_space<vmem>>, vector<128x128xbf16>
    %cst_7 = arith.constant dense<0.000000e+00> : vector<128x128xf32>
    %5 = tpu.matmul %3, %4, %cst_7 {dimension_numbers = #tpu.dot_dimension_numbers<[1], [0], [0], [1], [0, 0, 1, 1], [], []>} : vector<128x128xbf16>, vector<128x128xbf16>, vector<128x128xf32> -> vector<128x128xf32>
    %6 = arith.addf %2, %5 : vector<128x128xf32>
    %c0_8 = arith.constant 0 : index
    %c0_9 = arith.constant 0 : index
    %7 = vector.load %arg7[%c0_8, %c0_9] : memref<1x128xf32, #tpu.memory_space<vmem>>, vector<1x128xf32>
    %8 = vector.broadcast %7 : vector<1x128xf32> to vector<128x128xf32>
    %9 = arith.addf %6, %8 : vector<128x128xf32>
    %cst_10 = arith.constant 0.000000e+00 : f32
    %10 = vector.broadcast %cst_10 : f32 to vector<128x128xf32>
    %11 = arith.maximumf %9, %10 : vector<128x128xf32>
    %12 = arith.truncf %11 : vector<128x128xf32> to vector<128x128xbf16>
    %c0_11 = arith.constant 0 : index
    %c0_12 = arith.constant 0 : index
    %13 = vector.load %arg8[%c0_11, %c0_12] : memref<128x64xbf16, #tpu.memory_space<vmem>>, vector<128x64xbf16>
    %c0_13 = arith.constant 0 : index
    %c0_14 = arith.constant 0 : index
    %14 = vector.load %arg9[%c0_13, %c0_14] : memref<1x64xf32, #tpu.memory_space<vmem>>, vector<1x64xf32>
    %cst_15 = arith.constant dense<0.000000e+00> : vector<128x64xf32>
    %15 = tpu.matmul %12, %13, %cst_15 {dimension_numbers = #tpu.dot_dimension_numbers<[1], [0], [0], [1], [0, 0, 1, 1], [], []>} : vector<128x128xbf16>, vector<128x64xbf16>, vector<128x64xf32> -> vector<128x64xf32>
    %16 = vector.broadcast %14 : vector<1x64xf32> to vector<128x64xf32>
    %17 = arith.addf %15, %16 : vector<128x64xf32>
    %cst_16 = arith.constant 0.000000e+00 : f32
    %18 = vector.broadcast %cst_16 : f32 to vector<128x64xf32>
    %19 = arith.maximumf %17, %18 : vector<128x64xf32>
    %20 = arith.truncf %19 : vector<128x64xf32> to vector<128x64xbf16>
    %c0_17 = arith.constant 0 : index
    %c0_18 = arith.constant 0 : index
    %21 = vector.load %arg10[%c0_17, %c0_18] : memref<64x32xbf16, #tpu.memory_space<vmem>>, vector<64x32xbf16>
    %c0_19 = arith.constant 0 : index
    %c0_20 = arith.constant 0 : index
    %22 = vector.load %arg11[%c0_19, %c0_20] : memref<1x32xf32, #tpu.memory_space<vmem>>, vector<1x32xf32>
    %cst_21 = arith.constant dense<0.000000e+00> : vector<128x32xf32>
    %23 = tpu.matmul %20, %21, %cst_21 {dimension_numbers = #tpu.dot_dimension_numbers<[1], [0], [0], [1], [0, 0, 1, 1], [], []>} : vector<128x64xbf16>, vector<64x32xbf16>, vector<128x32xf32> -> vector<128x32xf32>
    %24 = vector.broadcast %22 : vector<1x32xf32> to vector<128x32xf32>
    %25 = arith.addf %23, %24 : vector<128x32xf32>
    %cst_22 = arith.constant 0.000000e+00 : f32
    %26 = vector.broadcast %cst_22 : f32 to vector<128x32xf32>
    %27 = arith.maximumf %25, %26 : vector<128x32xf32>
    %28 = arith.truncf %27 : vector<128x32xf32> to vector<128x32xbf16>
    %c0_23 = arith.constant 0 : index
    %c0_24 = arith.constant 0 : index
    %29 = vector.load %arg1[%c0_23, %c0_24] : memref<128x32xbf16, #tpu.memory_space<vmem>>, vector<128x32xbf16>
    %c0_25 = arith.constant 0 : index
    %c0_26 = arith.constant 0 : index
    %30 = vector.load %arg2[%c0_25, %c0_26] : memref<128x32xbf16, #tpu.memory_space<vmem>>, vector<128x32xbf16>
    %31 = arith.mulf %29, %30 : vector<128x32xbf16>
    %c0_27 = arith.constant 0 : index
    %c0_28 = arith.constant 0 : index
    %32 = vector.load %arg12[%c0_27, %c0_28] : memref<8x32xbf16, #tpu.memory_space<vmem>>, vector<8x32xbf16>
    %c0_29 = arith.constant 0 : index
    %c0_30 = arith.constant 0 : index
    %33 = vector.load %arg13[%c0_29, %c0_30] : memref<8x32xbf16, #tpu.memory_space<vmem>>, vector<8x32xbf16>
    %c0_31 = arith.constant 0 : index
    %c0_32 = arith.constant 0 : index
    %34 = vector.load %arg14[%c0_31, %c0_32] : memref<1x1xf32, #tpu.memory_space<vmem>>, vector<1x1xf32>
    %cst_33 = arith.constant dense<0.000000e+00> : vector<8x128xf32>
    %35 = tpu.matmul %32, %31, %cst_33 {dimension_numbers = #tpu.dot_dimension_numbers<[1], [1], [0], [0], [0, 0, 1, 0], [], []>} : vector<8x32xbf16>, vector<128x32xbf16>, vector<8x128xf32> -> vector<8x128xf32>
    %cst_34 = arith.constant dense<0.000000e+00> : vector<8x128xf32>
    %36 = tpu.matmul %33, %28, %cst_34 {dimension_numbers = #tpu.dot_dimension_numbers<[1], [1], [0], [0], [0, 0, 1, 0], [], []>} : vector<8x32xbf16>, vector<128x32xbf16>, vector<8x128xf32> -> vector<8x128xf32>
    %37 = arith.addf %35, %36 : vector<8x128xf32>
    %38 = vector.broadcast %34 : vector<1x1xf32> to vector<8x128xf32>
    %39 = arith.addf %37, %38 : vector<8x128xf32>
    %c0_35 = arith.constant 0 : index
    %c0_36 = arith.constant 0 : index
    %40 = vector.load %arg15[%c0_35, %c0_36] : memref<8x128xf32, #tpu.memory_space<vmem>>, vector<8x128xf32>
    tpu.vector_store %arg15[%c0_35, %c0_36], %39 {strides = array<i32>} : memref<8x128xf32, #tpu.memory_space<vmem>>, vector<8x128xf32>,
    return
  }
  func.func @transform_0(%arg0: i32) -> (i32, i32) {
    %c0_i32 = arith.constant 0 : i32
    %c0_i32_0 = arith.constant 0 : i32
    return %arg0, %c0_i32 : i32, i32
  }
  func.func @transform_1(%arg0: i32) -> (i32, i32) {
    %c0_i32 = arith.constant 0 : i32
    %c0_i32_0 = arith.constant 0 : i32
    return %arg0, %c0_i32 : i32, i32
  }
  func.func @transform_2(%arg0: i32) -> (i32, i32) {
    %c0_i32 = arith.constant 0 : i32
    %c0_i32_0 = arith.constant 0 : i32
    return %arg0, %c0_i32 : i32, i32
  }
  func.func @transform_3(%arg0: i32) -> (i32, i32) {
    %c0_i32 = arith.constant 0 : i32
    %c0_i32_0 = arith.constant 0 : i32
    return %arg0, %c0_i32 : i32, i32
  }
  func.func @transform_4(%arg0: i32) -> (i32, i32) {
    %c0_i32 = arith.constant 0 : i32
    %c0_i32_0 = arith.constant 0 : i32
    %c0_i32_1 = arith.constant 0 : i32
    return %c0_i32, %c0_i32_0 : i32, i32
  }
  func.func @transform_5(%arg0: i32) -> (i32, i32) {
    %c0_i32 = arith.constant 0 : i32
    %c0_i32_0 = arith.constant 0 : i32
    %c0_i32_1 = arith.constant 0 : i32
    return %c0_i32, %c0_i32_0 : i32, i32
  }
  func.func @transform_6(%arg0: i32) -> (i32, i32) {
    %c0_i32 = arith.constant 0 : i32
    %c0_i32_0 = arith.constant 0 : i32
    %c0_i32_1 = arith.constant 0 : i32
    return %c0_i32, %c0_i32_0 : i32, i32
  }
  func.func @transform_7(%arg0: i32) -> (i32, i32) {
    %c0_i32 = arith.constant 0 : i32
    %c0_i32_0 = arith.constant 0 : i32
    %c0_i32_1 = arith.constant 0 : i32
    return %c0_i32, %c0_i32_0 : i32, i32
  }
  func.func @transform_8(%arg0: i32) -> (i32, i32) {
    %c0_i32 = arith.constant 0 : i32
    %c0_i32_0 = arith.constant 0 : i32
    %c0_i32_1 = arith.constant 0 : i32
    return %c0_i32, %c0_i32_0 : i32, i32
  }
  func.func @transform_9(%arg0: i32) -> (i32, i32) {
    %c0_i32 = arith.constant 0 : i32
    %c0_i32_0 = arith.constant 0 : i32
    %c0_i32_1 = arith.constant 0 : i32
    return %c0_i32, %c0_i32_0 : i32, i32
  }
  func.func @transform_10(%arg0: i32) -> (i32, i32) {
    %c0_i32 = arith.constant 0 : i32
    %c0_i32_0 = arith.constant 0 : i32
    %c0_i32_1 = arith.constant 0 : i32
    return %c0_i32, %c0_i32_0 : i32, i32
  }
  func.func @transform_11(%arg0: i32) -> (i32, i32) {
    %c0_i32 = arith.constant 0 : i32
    %c0_i32_0 = arith.constant 0 : i32
    %c0_i32_1 = arith.constant 0 : i32
    return %c0_i32, %c0_i32_0 : i32, i32
  }
  func.func @transform_12(%arg0: i32) -> (i32, i32) {
    %c0_i32 = arith.constant 0 : i32
    %c0_i32_0 = arith.constant 0 : i32
    %c0_i32_1 = arith.constant 0 : i32
    return %c0_i32, %c0_i32_0 : i32, i32
  }
  func.func @transform_13(%arg0: i32) -> (i32, i32) {
    %c0_i32 = arith.constant 0 : i32
    %c0_i32_0 = arith.constant 0 : i32
    %c0_i32_1 = arith.constant 0 : i32
    return %c0_i32, %c0_i32_0 : i32, i32
  }
  func.func @transform_14(%arg0: i32) -> (i32, i32) {
    %c0_i32 = arith.constant 0 : i32
    %c0_i32_0 = arith.constant 0 : i32
    return %c0_i32, %arg0 : i32, i32
  }
}

</mosaic_0001>

<bundles_post_ra>
// kernel: neucf_forward.1
= control target key start
LH: loop header
LB: loop body
LE: loop exit
PB: predicated region body
PF: predicated region fallthrough
CT: control target
= control target key end

     0   :  { %vm778_vm0 = vcmask 523264   ;;  %vm975_vm1 = vcmask 261120   ;;  %vm1534_vm2 = vmmov 0   ;;  %s1922_s5 = inlined_call_operand.vmem [shape: bf16[128,128], index: 5, kind: input, shape index: {}]   ;;  %s1923_s3 = inlined_call_operand.vmem [shape: bf16[128,128], index: 3, kind: input, shape index: {}]   ;;  %s1924_s4 = inlined_call_operand.vmem [shape: bf16[128,128], index: 4, kind: input, shape index: {}]   ;;  %s1925_s2 = inlined_call_operand.vmem [shape: bf16[128,128], index: 2, kind: input, shape index: {}]   ;;  %s1926_s7 = inlined_call_operand.vmem [shape: bf16[128,64], index: 7, kind: input, shape index: {}]   ;;  %s1927_s9 = inlined_call_operand.vmem [shape: bf16[64,32], index: 9, kind: input, shape index: {}]   ;;  %s1928_s6 = inlined_call_operand.vmem [shape: f32[1,128], index: 6, kind: input, shape index: {}]   ;;  %s1929_s8 = inlined_call_operand.vmem [shape: f32[1,64], index: 8, kind: input, shape index: {}]   ;;  %s1930_s0 = inlined_call_operand.vmem [shape: bf16[128,32], index: 0, kind: input, shape index: {}]   ;;  %s1931_s1 = inlined_call_operand.vmem [shape: bf16[128,32], index: 1, kind: input, shape index: {}]   ;;  %s1932_s11 = inlined_call_operand.vmem [shape: bf16[8,32], index: 11, kind: input, shape index: {}]   ;;  %s1933_s13 = inlined_call_operand.<no memory space> [shape: f32[1,1], index: 13, kind: input, shape index: {}]   ;;  %s1934_s10 = inlined_call_operand.vmem [shape: f32[1,32], index: 10, kind: input, shape index: {}]   ;;  %s1935_s12 = inlined_call_operand.vmem [shape: bf16[8,32], index: 12, kind: input, shape index: {}]   ;;  %s1936_s14 = inlined_call_operand.vmem [shape: f32[8,128], index: 14, kind: output, shape index: {}]  }
   0x1   :  { %v1489_v0 = vld [vmem:[%s1922_s5] sm:$0xff]   ;;  %v1490_v1 = vld [vmem:[%s1922_s5 + $0x8] sm:$0xff]   ;;  %v1491_v2 = vld [vmem:[%s1922_s5 + $0x10] sm:$0xff]  }
   0x2   :  { %1309 = vmatprep.subr.bf16.mxu0 %v1489_v0  ;;  %v1492_v3 = vld [vmem:[%s1922_s5 + $0x18] sm:$0xff]   ;;  %v1497_v4 = vld [vmem:[%s1923_s3] sm:$0xff]   ;;  %v1494_v6 = vld [vmem:[%s1922_s5 + $0x28] sm:$0xff]  }
   0x3   :  { %1310 = vmatpush3.bf16.msra.mxu0 %v1489_v0  ;;  %1325 = vmatprep.mubr.bf16.mxu0 %v1497_v4  ;;  %v1493_v5 = vld [vmem:[%s1922_s5 + $0x20] sm:$0xff]   ;;  %v1495_v7 = vld [vmem:[%s1922_s5 + $0x30] sm:$0xff]   ;;  %v1496_v8 = vld [vmem:[%s1922_s5 + $0x38] sm:$0xff]  }
   0x4   :  { %1311 = vmatprep.subr.bf16.mxu0 %v1490_v1  ;;  %v1499_v9 = vld [vmem:[%s1924_s4] sm:$0xff]   ;;  %v1498_v10 = vld [vmem:[%s1923_s3 + $0x8] sm:$0xff]   ;;  %v1501_v12 = vld [vmem:[%s1923_s3 + $0x10] sm:$0xff]  }
   0x5   :  { %v1500_v11 = vld [vmem:[%s1924_s4 + $0x8] sm:$0xff]   ;;  %v1521_v13 = vld [vmem:[%s1926_s7] sm:$0xff]   ;;  %v1502_v15 = vld [vmem:[%s1923_s3 + $0x18] sm:$0xff]  }
   0x6   :  { %v1522_v14 = vld [vmem:[%s1926_s7 + $0x8] sm:$0xff]   ;;  %1373 = vmatprep.subr.bf16.mxu1 %v1521_v13  ;;  %v1503_v16 = vld [vmem:[%s1924_s4 + $0x10] sm:$0xff]   ;;  %v1505_v18 = vld [vmem:[%s1923_s3 + $0x20] sm:$0xff]  }
   0x7   :  { %1312 = vmatpush3.bf16.msra.mxu0 %v1490_v1  ;;  %1374 = vmatpush3.bf16.msra.mxu1 %v1521_v13  ;;  %v1523_v17 = vld [vmem:[%s1926_s7 + $0x10] sm:$0xff]   ;;  %v1504_v19 = vld [vmem:[%s1924_s4 + $0x18] sm:$0xff]   ;;  %v1507_v21 = vld [vmem:[%s1924_s4 + $0x20] sm:$0xff]  }
   0x8   :  { %1313 = vmatprep.subr.bf16.mxu0 %v1491_v2  ;;  %1375 = vmatprep.subr.bf16.mxu1 %v1522_v14  ;;  %v1524_v20 = vld [vmem:[%s1926_s7 + $0x18] sm:$0xff]   ;;  %v1525_v22 = vld [vmem:[%s1926_s7 + $0x20] sm:$0xff]   ;;  %v1506_v23 = vld [vmem:[%s1923_s3 + $0x28] sm:$0xff]  }
   0x9   :  { %v1509_v24 = vld [vmem:[%s1923_s3 + $0x30] sm:$0xff]   ;;  %v1508_v25 = vld [vmem:[%s1924_s4 + $0x28] sm:$0xff]   ;;  %v1510_v28 = vld [vmem:[%s1923_s3 + $0x38] sm:$0xff]  }
   0xa   :  { %v1526_v26 = vld [vmem:[%s1926_s7 + $0x28] sm:$0xff]   ;;  %v1511_v27 = vld [vmem:[%s1924_s4 + $0x30] sm:$0xff]   ;;  %v1513_v29 = vld [vmem:[%s1925_s2] sm:$0xff]  }
   0xb   :  { %1314 = vmatpush3.bf16.msra.mxu0 %v1491_v2  ;;  %1376 = vmatpush3.bf16.msra.mxu1 %v1522_v14  ;;  %v1512_v30 = vld [vmem:[%s1924_s4 + $0x38] sm:$0xff]   ;;  %v1514_v31 = vld [vmem:[%s1925_s2 + $0x8] sm:$0xff]   ;;  %v1515_v32 = vld [vmem:[%s1925_s2 + $0x10] sm:$0xff]  }
   0xc   :  { %1315 = vmatprep.subr.bf16.mxu0 %v1492_v3  ;;  %1377 = vmatprep.subr.bf16.mxu1 %v1523_v17  ;;  %v1516_v33 = vld [vmem:[%s1925_s2 + $0x18] sm:$0xff]   ;;  %v1517_v34 = vld [vmem:[%s1925_s2 + $0x20] sm:$0xff]   ;;  %v1518_v35 = vld [vmem:[%s1925_s2 + $0x28] sm:$0xff]  }
   0xd   :  { %v1519_v36 = vld [vmem:[%s1925_s2 + $0x30] sm:$0xff]   ;;  %v1520_v37 = vld [vmem:[%s1925_s2 + $0x38] sm:$0xff]   ;;  %v1529_v40 = vld [vmem:[%s1927_s9] sm:$0xff]  }
   0xe   :  { %v1527_v38 = vld [vmem:[%s1926_s7 + $0x30] sm:$0xff]   ;;  %v1528_v39 = vld [vmem:[%s1926_s7 + $0x38] sm:$0xff]   ;;  %v1737_v41 = vld [vmem:[%s1928_s6] ss:$0 sm:$0xff] }
   0xf   :  { %1316 = vmatpush3.bf16.msra.mxu0 %v1492_v3  ;;  %1378 = vmatpush3.bf16.msra.mxu1 %v1523_v17  ;;  %v1530_v59 = vld [vmem:[%s1927_s9 + $0x8] sm:$0xff]   ;;  %v1531_v3 = vld [vmem:[%s1927_s9 + $0x10] sm:$0xff]  }
  0x10   :  { %1317 = vmatprep.subr.bf16.mxu0 %v1493_v5  ;;  %1379 = vmatprep.subr.bf16.mxu1 %v1524_v20 }
  0x13   :  { %1318 = vmatpush3.bf16.msra.mxu0 %v1493_v5  ;;  %1380 = vmatpush3.bf16.msra.mxu1 %v1524_v20 }
  0x14   :  { %1319 = vmatprep.subr.bf16.mxu0 %v1494_v6  ;;  %1381 = vmatprep.subr.bf16.mxu1 %v1525_v22 }
  0x17   :  { %1320 = vmatpush3.bf16.msra.mxu0 %v1494_v6  ;;  %1382 = vmatpush3.bf16.msra.mxu1 %v1525_v22 }
  0x18   :  { %1321 = vmatprep.subr.bf16.mxu0 %v1495_v7  ;;  %1383 = vmatprep.subr.bf16.mxu1 %v1526_v26 }
  0x1b   :  { %1322 = vmatpush3.bf16.msra.mxu0 %v1495_v7  ;;  %1384 = vmatpush3.bf16.msra.mxu1 %v1526_v26 }
  0x1c   :  { %1323 = vmatprep.subr.bf16.mxu0 %v1496_v8  ;;  %1385 = vmatprep.subr.bf16.mxu1 %v1527_v38 }
  0x1f   :  { %1324 = vmatpush3.bf16.msra.mxu0 %v1496_v8  ;;  %1386 = vmatpush3.bf16.msra.mxu1 %v1527_v38 }
  0x20   :  { %1341 = vmatprep.subr.bf16.mxu0 %v1499_v9  ;;  %1387 = vmatprep.subr.bf16.mxu1 %v1528_v39 }
  0x22   :  { %1326 = vmatmul.mubr.bf16.vlgmr.msra.gmra.mrb[0].mxu0 %v1498_v10 }
  0x23   :  { %1342 = vmatpush3.bf16.msra.mxu0 %v1499_v9  ;;  %1329 = vmatprep.mubr.bf16.mxu0 %v1501_v12 }
  0x24   :  { %1343 = vmatprep.subr.bf16.mxu0 %v1500_v11  ;;  %1388 = vmatpush3.bf16.msra.mxu1 %v1528_v39 }
  0x25   :  { %1405 = vmatprep.subr.bf16.mxu1 %v1529_v40 }
  0x27   :  { %1344 = vmatpush3.bf16.msra.mxu0 %v1500_v11 }
  0x28   :  { %1345 = vmatprep.subr.bf16.mxu0 %v1503_v16 }
  0x2a   :  { %1330 = vmatmul.mubr.bf16.gmra.mrb[4].mxu0 %v1502_v15 }
  0x2b   :  { %1346 = vmatpush3.bf16.msra.mxu0 %v1503_v16  ;;  %1333 = vmatprep.mubr.bf16.mxu0 %v1505_v18 }
  0x2c   :  { %1347 = vmatprep.subr.bf16.mxu0 %v1504_v19 }
  0x2f   :  { %1348 = vmatpush3.bf16.msra.mxu0 %v1504_v19 }
  0x30   :  { %1349 = vmatprep.subr.bf16.mxu0 %v1507_v21 }
  0x32   :  { %1334 = vmatmul.mubr.bf16.gmra.mrb[8].mxu0 %v1506_v23 }
  0x33   :  { %1350 = vmatpush3.bf16.msra.mxu0 %v1507_v21  ;;  %1337 = vmatprep.mubr.bf16.mxu0 %v1509_v24 }
  0x34   :  { %1351 = vmatprep.subr.bf16.mxu0 %v1508_v25 }
  0x37   :  { %1352 = vmatpush3.bf16.msra.mxu0 %v1508_v25 }
  0x38   :  { %1353 = vmatprep.subr.bf16.mxu0 %v1511_v27 }
  0x3a   :  { %1338 = vmatmul.mubr.bf16.gmra.mrb[12].mxu0 %v1510_v28 }
  0x3b   :  { %1354 = vmatpush3.bf16.msra.mxu0 %v1511_v27  ;;  %1357 = vmatprep.mubr.bf16.mxu0 %v1513_v29 }
  0x3c   :  { %1355 = vmatprep.subr.bf16.mxu0 %v1512_v30 }
  0x3f   :  { %1356 = vmatpush3.bf16.msra.mxu0 %v1512_v30 }
  0x42   :  { %1358 = vmatmul.mubr.bf16.vlgmr.msra.gmra.mrb[0].mxu0 %v1514_v31 }
  0x43   :  { %1361 = vmatprep.mubr.bf16.mxu0 %v1515_v32 }
  0x4a   :  { %1362 = vmatmul.mubr.bf16.gmra.mrb[4].mxu0 %v1516_v33 }
  0x4b   :  { %1365 = vmatprep.mubr.bf16.mxu0 %v1517_v34 }
  0x52   :  { %1366 = vmatmul.mubr.bf16.gmra.mrb[8].mxu0 %v1518_v35 }
  0x53   :  { %1369 = vmatprep.mubr.bf16.mxu0 %v1519_v36  ;;  %v1532_v36 = vld [vmem:[%s1927_s9 + $0x18] sm:$0xff]  }
  0x5a   :  { %1370 = vmatmul.mubr.bf16.gmra.mrb[12].mxu0 %v1520_v37  ;;  %v1198_v37 = vld [vmem:[%s1929_s8] ss:$0 sm:$0xff] }
 0x115   :  { %v1359_v42 = vpop.f32.mrb[0].mxu0 }
 0x116   :  { %v509_v43 = vadd.f32 %v1359_v42, %v1737_v41  ;;  %v437_v44 = vpop.f32.mrb[1].mxu0 }
 0x117   :  { %v507_v45 = vadd.f32 %v1737_v41, %v437_v44  ;;  %v1360_v46 = vpop.f32.mrb[2].mxu0 }
 0x118   :  { %v510_v47 = vadd.f32 %v1360_v46, %v1737_v41  ;;  %v440_v48 = vpop.f32.mrb[3].mxu0  ;;  %v525_v50 = vmax.f32 %v509_v43, 0.0 }
 0x119   :  { %v508_v49 = vadd.f32 %v1737_v41, %v440_v48  ;;  %v523_v52 = vmax.f32 %v507_v45, 0.0 }
 0x11a   :  { %v526_v51 = vmax.f32 %v510_v47, 0.0 }
 0x11b   :  { %v524_v53 = vmax.f32 %v508_v49, 0.0 }
 0x11c   :  { %v540_v54 = vpack.c.bf16 %v526_v51, %v525_v50 }
 0x11d   :  { %v1363_v55 = vpop.f32.mrb[4].mxu0  ;;  %v539_v56 = vpack.c.bf16 %v524_v53, %v523_v52 }
 0x11e   :  { %v513_v57 = vadd.f32 %v1363_v55, %v1737_v41  ;;  %v453_v58 = vpop.f32.mrb[5].mxu0 }
 0x11f   :  { %v511_v60 = vadd.f32 %v1737_v41, %v453_v58  ;;  %v1364_v61 = vpop.f32.mrb[6].mxu0  ;;  %1389 = vmatprep.mubr.bf16.mxu1 %v539_v56 }
 0x120   :  { %v514_v62 = vadd.f32 %v1364_v61, %v1737_v41  ;;  %v456_v63 = vpop.f32.mrb[7].mxu0  ;;  %1390 = vmatmul.mubr.bf16.vlgmr.msra.gmra.mrb[0].mxu1 %v540_v54  ;;  %v529_v1 = vmax.f32 %v513_v57, 0.0 }
 0x121   :  { %v512_v0 = vadd.f32 %v1737_v41, %v456_v63  ;;  %1406 = vmatpush3.bf16.msra.mxu1 %v1529_v40  ;;  %v527_v4 = vmax.f32 %v511_v60, 0.0 }
 0x122   :  { %v530_v2 = vmax.f32 %v514_v62, 0.0  ;;  %1407 = vmatprep.subr.bf16.mxu1 %v1530_v59 }
 0x123   :  { %v528_v5 = vmax.f32 %v512_v0, 0.0 }
 0x124   :  { %v542_v6 = vpack.c.bf16 %v530_v2, %v529_v1 }
 0x125   :  { %v541_v7 = vpack.c.bf16 %v528_v5, %v527_v4  ;;  %v1367_v8 = vpop.f32.mrb[8].mxu0  ;;  %1408 = vmatpush3.bf16.msra.mxu1 %v1530_v59 }
 0x126   :  { %v517_v9 = vadd.f32 %v1367_v8, %v1737_v41  ;;  %v469_v10 = vpop.f32.mrb[9].mxu0  ;;  %1409 = vmatprep.subr.bf16.mxu1 %v1531_v3 }
 0x127   :  { %v515_v11 = vadd.f32 %v1737_v41, %v469_v10  ;;  %v1368_v12 = vpop.f32.mrb[10].mxu0  ;;  %1393 = vmatprep.mubr.bf16.mxu1 %v541_v7 }
 0x128   :  { %v518_v13 = vadd.f32 %v1368_v12, %v1737_v41  ;;  %v472_v14 = vpop.f32.mrb[11].mxu0  ;;  %1394 = vmatmul.mubr.bf16.gmra.mrb[4].mxu1 %v542_v6  ;;  %v533_v16 = vmax.f32 %v517_v9, 0.0 }
 0x129   :  { %v516_v15 = vadd.f32 %v1737_v41, %v472_v14  ;;  %1410 = vmatpush3.bf16.msra.mxu1 %v1531_v3  ;;  %v531_v18 = vmax.f32 %v515_v11, 0.0 }
 0x12a   :  { %v534_v17 = vmax.f32 %v518_v13, 0.0  ;;  %1411 = vmatprep.subr.bf16.mxu1 %v1532_v36 }
 0x12b   :  { %v532_v19 = vmax.f32 %v516_v15, 0.0 }
 0x12c   :  { %v544_v20 = vpack.c.bf16 %v534_v17, %v533_v16 }
 0x12d   :  { %v543_v21 = vpack.c.bf16 %v532_v19, %v531_v18  ;;  %v1371_v22 = vpop.f32.mrb[12].mxu0  ;;  %1412 = vmatpush3.bf16.msra.mxu1 %v1532_v36 }
 0x12e   :  { %v521_v23 = vadd.f32 %v1371_v22, %v1737_v41  ;;  %v485_v24 = vpop.f32.mrb[13].mxu0 }
 0x12f   :  { %v519_v25 = vadd.f32 %v1737_v41, %v485_v24  ;;  %v1372_v26 = vpop.f32.mrb[14].mxu0  ;;  %1397 = vmatprep.mubr.bf16.mxu1 %v543_v21 }
 0x130   :  { %v522_v27 = vadd.f32 %v1372_v26, %v1737_v41  ;;  %v488_v28 = vpop.f32.mrb[15].mxu0  ;;  %1398 = vmatmul.mubr.bf16.gmra.mrb[8].mxu1 %v544_v20  ;;  %v537_v30 = vmax.f32 %v521_v23, 0.0 }
 0x131   :  { %v520_v29 = vadd.f32 %v1737_v41, %v488_v28  ;;  %v535_v32 = vmax.f32 %v519_v25, 0.0 }
 0x132   :  { %v538_v31 = vmax.f32 %v522_v27, 0.0 }
 0x133   :  { %v536_v33 = vmax.f32 %v520_v29, 0.0 }
 0x134   :  { %v546_v34 = vpack.c.bf16 %v538_v31, %v537_v30  ;;  %v924_v30 = vld [vmem:[%s1930_s0] sm:$0xf]  ;;  %v925_v31 = vld [vmem:[%s1930_s0 + $0x4] sm:$0xf] }
 0x135   :  { %v545_v35 = vpack.c.bf16 %v536_v33, %v535_v32  ;;  %v940_v32 = vld [vmem:[%s1931_s1] sm:$0xf]  ;;  %v941_v33 = vld [vmem:[%s1931_s1 + $0x4] sm:$0xf] }
 0x137   :  { %1401 = vmatprep.mubr.bf16.mxu1 %v545_v35  ;;  %v957_v35 = vmul.bf16 %v941_v33, %v925_v31  ;;  %v972_v31 = vld [vmem:[%s1932_s11] sm:$0xf]  ;;  %v19_v33 = vstv %s1933_s13 }
 0x138   :  { %1402 = vmatmul.mubr.bf16.gmra.mrb[12].mxu1 %v546_v34  ;;  %v956_v34 = vmul.bf16 %v940_v32, %v924_v30  ;;  %v1535_v32 = vmov 0   ;;  %20 = vst [vmem:[#allocation2] sm:$0x1] %v19_v33 }
 0x139   :  { %1488 = vset.pattern.permute.xlu0 %v1535_v32 }
 0x13a   :  { %v1221_v36 = vcombine.low %v956_v34, %v957_v35  ;;  %v1207_v35 = vld [vmem:[%s1934_s10] ss:$0 sm:$0xff] }
 0x13f   :  { %v1230_v34 = vld [vmem:[#allocation2] ss:$0 sm:$0xff] }
 0x140   :  { %1156 = vperm.xlu0 %1488, %v1230_v34  }
 0x1f3   :  { %v1391_v38 = vpop.f32.mrb[0].mxu1 }
 0x1f4   :  { %v661_v39 = vadd.f32 %v1391_v38, %v1198_v37  ;;  %v652_v40 = vpop.f32.mrb[1].mxu1  ;;  %v1087_v38 = vsel %vm975_vm1, %v1221_v36, 0 }
 0x1f5   :  { %v653_v41 = vadd.f32 %v1198_v37, %v652_v40  ;;  %v1392_v42 = vpop.f32.mrb[2].mxu1  ;;  %v927_v40 = vld [vmem:[%s1930_s0 + $0xc] sm:$0xf] }
 0x1f6   :  { %v664_v43 = vadd.f32 %v1392_v42, %v1198_v37  ;;  %v655_v44 = vpop.f32.mrb[3].mxu1  ;;  %v717_v46 = vmax.f32 %v661_v39, 0.0  ;;  %v926_v39 = vld [vmem:[%s1930_s0 + $0x8] sm:$0xf]  ;;  %v943_v42 = vld [vmem:[%s1931_s1 + $0xc] sm:$0xf] }
 0x1f7   :  { %v656_v45 = vadd.f32 %v1198_v37, %v655_v44  ;;  %v715_v48 = vmax.f32 %v653_v41, 0.0  ;;  %v942_v41 = vld [vmem:[%s1931_s1 + $0x8] sm:$0xf]  ;;  %v959_v44 = vmul.bf16 %v943_v42, %v927_v40 }
 0x1f8   :  { %v718_v47 = vmax.f32 %v664_v43, 0.0  ;;  %v958_v43 = vmul.bf16 %v942_v41, %v926_v39 }
 0x1f9   :  { %v716_v49 = vmax.f32 %v656_v45, 0.0 }
 0x1fa   :  { %v732_v50 = vpack.c.bf16 %v718_v47, %v717_v46  ;;  %v1222_v45 = vcombine.low %v958_v43, %v959_v44  ;;  %v928_v47 = vld [vmem:[%s1930_s0 + $0x10] sm:$0xf] }
 0x1fb   :  { %v731_v51 = vpack.c.bf16 %v716_v49, %v715_v48  ;;  %v1395_v52 = vpop.f32.mrb[4].mxu1  ;;  %v929_v48 = vld [vmem:[%s1930_s0 + $0x14] sm:$0xf]  ;;  %v944_v49 = vld [vmem:[%s1931_s1 + $0x10] sm:$0xf] }
 0x1fc   :  { %v677_v53 = vadd.f32 %v1395_v52, %v1198_v37  ;;  %v668_v54 = vpop.f32.mrb[5].mxu1  ;;  %v1090_v46 = vsel %vm975_vm1, %v1222_v45, 0 }
 0x1fd   :  { %v669_v55 = vadd.f32 %v1198_v37, %v668_v54  ;;  %v1396_v56 = vpop.f32.mrb[6].mxu1  ;;  %1413 = vmatprep.mubr.msk.bf16.mxu1 %vm778_vm0, %v731_v51  ;;  %v960_v51 = vmul.bf16 %v944_v49, %v928_v47 }
 0x1fe   :  { %v680_v57 = vadd.f32 %v1396_v56, %v1198_v37  ;;  %v671_v58 = vpop.f32.mrb[7].mxu1  ;;  %1414 = vmatmul.mubr.msk.bf16.vlgmr.msra.gmra.mrb[16].mxu1 %vm778_vm0, %v732_v50  ;;  %v721_v60 = vmax.f32 %v677_v53, 0.0  ;;  %v945_v50 = vld [vmem:[%s1931_s1 + $0x14] sm:$0xf]  ;;  %v931_v56 = vld [vmem:[%s1930_s0 + $0x1c] sm:$0xf] }
 0x1ff   :  { %v672_v59 = vadd.f32 %v1198_v37, %v671_v58  ;;  %v719_v62 = vmax.f32 %v669_v55, 0.0  ;;  %v961_v52 = vmul.bf16 %v945_v50, %v929_v48  ;;  %v930_v55 = vld [vmem:[%s1930_s0 + $0x18] sm:$0xf]  ;;  %v947_v58 = vld [vmem:[%s1931_s1 + $0x1c] sm:$0xf] }
 0x200   :  { %v722_v61 = vmax.f32 %v680_v57, 0.0  ;;  %v946_v57 = vld [vmem:[%s1931_s1 + $0x18] sm:$0xf] }
 0x201   :  { %v720_v63 = vmax.f32 %v672_v59, 0.0  ;;  %v1223_v53 = vcombine.low %v960_v51, %v961_v52  ;;  %v962_v59 = vmul.bf16 %v946_v57, %v930_v55 }
 0x202   :  { %v734_v0 = vpack.c.bf16 %v722_v61, %v721_v60  ;;  %v963_v60 = vmul.bf16 %v947_v58, %v931_v56 }
 0x203   :  { %v733_v1 = vpack.c.bf16 %v720_v63, %v719_v62  ;;  %v1399_v2 = vpop.f32.mrb[8].mxu1  ;;  %v1093_v54 = vsel %vm975_vm1, %v1223_v53, 0  ;;  %v932_v63 = vld [vmem:[%s1930_s0 + $0x20] sm:$0xf] }
 0x204   :  { %v693_v3 = vadd.f32 %v1399_v2, %v1198_v37  ;;  %v684_v4 = vpop.f32.mrb[9].mxu1  ;;  %v1224_v61 = vcombine.low %v962_v59, %v963_v60  ;;  %v949_v2 = vld [vmem:[%s1931_s1 + $0x24] sm:$0xf] }
 0x205   :  { %v685_v5 = vadd.f32 %v1198_v37, %v684_v4  ;;  %v1400_v6 = vpop.f32.mrb[10].mxu1  ;;  %1417 = vmatprep.mubr.msk.bf16.mxu1 %vm778_vm0, %v733_v1  ;;  %v948_v1 = vld [vmem:[%s1931_s1 + $0x20] sm:$0xf] }
 0x206   :  { %v696_v7 = vadd.f32 %v1400_v6, %v1198_v37  ;;  %v687_v8 = vpop.f32.mrb[11].mxu1  ;;  %1418 = vmatmul.mubr.msk.bf16.gmra.mrb[20].mxu1 %vm778_vm0, %v734_v0  ;;  %v725_v10 = vmax.f32 %v693_v3, 0.0  ;;  %v1096_v62 = vsel %vm975_vm1, %v1224_v61, 0  ;;  %v933_v0 = vld [vmem:[%s1930_s0 + $0x24] sm:$0xf]  ;;  %v964_v3 = vmul.bf16 %v948_v1, %v932_v63 }
 0x207   :  { %v688_v9 = vadd.f32 %v1198_v37, %v687_v8  ;;  %v723_v12 = vmax.f32 %v685_v5, 0.0  ;;  %v965_v4 = vmul.bf16 %v949_v2, %v933_v0  ;;  %v935_v8 = vld [vmem:[%s1930_s0 + $0x2c] sm:$0xf] }
 0x208   :  { %v726_v11 = vmax.f32 %v696_v7, 0.0  ;;  %v934_v7 = vld [vmem:[%s1930_s0 + $0x28] sm:$0xf] }
 0x209   :  { %v724_v13 = vmax.f32 %v688_v9, 0.0  ;;  %v1225_v5 = vcombine.low %v964_v3, %v965_v4  ;;  %v950_v9 = vld [vmem:[%s1931_s1 + $0x28] sm:$0xf] }
 0x20a   :  { %v736_v14 = vpack.c.bf16 %v726_v11, %v725_v10  ;;  %v951_v10 = vld [vmem:[%s1931_s1 + $0x2c] sm:$0xf]  ;;  %v966_v11 = vmul.bf16 %v950_v9, %v934_v7 }
 0x20b   :  { %v735_v15 = vpack.c.bf16 %v724_v13, %v723_v12  ;;  %v1403_v16 = vpop.f32.mrb[12].mxu1  ;;  %v1099_v6 = vsel %vm975_vm1, %v1225_v5, 0  ;;  %v967_v12 = vmul.bf16 %v951_v10, %v935_v8 }
 0x20c   :  { %v709_v17 = vadd.f32 %v1403_v16, %v1198_v37  ;;  %v700_v18 = vpop.f32.mrb[13].mxu1  ;;  %v937_v16 = vld [vmem:[%s1930_s0 + $0x34] sm:$0xf] }
 0x20d   :  { %v701_v19 = vadd.f32 %v1198_v37, %v700_v18  ;;  %v1404_v20 = vpop.f32.mrb[14].mxu1  ;;  %1421 = vmatprep.mubr.msk.bf16.mxu1 %vm778_vm0, %v735_v15  ;;  %v1226_v13 = vcombine.low %v966_v11, %v967_v12  ;;  %v936_v15 = vld [vmem:[%s1930_s0 + $0x30] sm:$0xf]  ;;  %v953_v18 = vld [vmem:[%s1931_s1 + $0x34] sm:$0xf] }
 0x20e   :  { %v712_v21 = vadd.f32 %v1404_v20, %v1198_v37  ;;  %v703_v22 = vpop.f32.mrb[15].mxu1  ;;  %1422 = vmatmul.mubr.msk.bf16.gmra.mrb[24].mxu1 %vm778_vm0, %v736_v14  ;;  %v729_v24 = vmax.f32 %v709_v17, 0.0  ;;  %v952_v17 = vld [vmem:[%s1931_s1 + $0x30] sm:$0xf]  ;;  %v969_v20 = vmul.bf16 %v953_v18, %v937_v16 }
 0x20f   :  { %v704_v23 = vadd.f32 %v1198_v37, %v703_v22  ;;  %v727_v26 = vmax.f32 %v701_v19, 0.0  ;;  %v1533_v37 = vmov 0.0   ;;  %v1102_v14 = vsel %vm975_vm1, %v1226_v13, 0 }
 0x210   :  { %v730_v25 = vmax.f32 %v712_v21, 0.0  ;;  %1449 = vmatprep.subr.bf16.mxu1 %v1533_v37  ;;  %1429 = vmatprep.subr.bf16.mxu0 %v1533_v37  ;;  %v968_v19 = vmul.bf16 %v952_v17, %v936_v15 }
 0x211   :  { %v728_v27 = vmax.f32 %v704_v23, 0.0  ;;  %1450 = vmatpush3.bf16.xpose.msra.mxu1 %v1087_v38  ;;  %v938_v23 = vld [vmem:[%s1930_s0 + $0x38] sm:$0xf]  ;;  %1445 = vmatprep.mubr.msk.bf16.mxu0 %vm1534_vm2, %v1533_v37 }
 0x212   :  { %v738_v28 = vpack.c.bf16 %v730_v25, %v729_v24  ;;  %1451 = vmatprep.subr.bf16.mxu1 %v1533_v37  ;;  %v1227_v21 = vcombine.low %v968_v19, %v969_v20  ;;  %v939_v24 = vld [vmem:[%s1930_s0 + $0x3c] sm:$0xf]  ;;  %v954_v25 = vld [vmem:[%s1931_s1 + $0x38] sm:$0xf] }
 0x213   :  { %v737_v29 = vpack.c.bf16 %v728_v27, %v727_v26  ;;  %v955_v26 = vld [vmem:[%s1931_s1 + $0x3c] sm:$0xf]  ;;  %v970_v27 = vmul.bf16 %v954_v25, %v938_v23 }
 0x214   :  { %v1105_v22 = vsel %vm975_vm1, %v1227_v21, 0 }
 0x215   :  { %1425 = vmatprep.mubr.msk.bf16.mxu1 %vm778_vm0, %v737_v29 }
 0x216   :  { %1426 = vmatmul.mubr.msk.bf16.gmra.mrb[28].mxu1 %vm778_vm0, %v738_v28  ;;  %v971_v28 = vmul.bf16 %v955_v26, %v939_v24 }
 0x217   :  { %1465 = vmatprep.mubr.msk.bf16.mxu1 %vm1534_vm2, %v1533_v37 }
 0x218   :  { %v1228_v29 = vcombine.low %v970_v27, %v971_v28 }
 0x219   :  { %1452 = vmatpush3.bf16.xpose.msra.mxu1 %v1090_v46 }
 0x21a   :  { %1453 = vmatprep.subr.bf16.mxu1 %v1533_v37  ;;  %v1108_v30 = vsel %vm975_vm1, %v1228_v29, 0 }
 0x221   :  { %1454 = vmatpush3.bf16.xpose.msra.mxu1 %v1093_v54 }
 0x222   :  { %1455 = vmatprep.subr.bf16.mxu1 %v1533_v37 }
 0x229   :  { %1456 = vmatpush3.bf16.xpose.msra.mxu1 %v1096_v62 }
 0x22a   :  { %1457 = vmatprep.subr.bf16.mxu1 %v1533_v37 }
 0x231   :  { %1458 = vmatpush3.bf16.xpose.msra.mxu1 %v1099_v6 }
 0x232   :  { %1459 = vmatprep.subr.bf16.mxu1 %v1533_v37 }
 0x239   :  { %1460 = vmatpush3.bf16.xpose.msra.mxu1 %v1102_v14 }
 0x23a   :  { %1461 = vmatprep.subr.bf16.mxu1 %v1533_v37 }
 0x241   :  { %1462 = vmatpush3.bf16.xpose.msra.mxu1 %v1105_v22 }
 0x242   :  { %1463 = vmatprep.subr.bf16.mxu1 %v1533_v37 }
 0x249   :  { %1464 = vmatpush3.bf16.xpose.msra.mxu1 %v1108_v30 }
 0x250   :  { %1466 = vmatmul.mubr.msk.bf16.vlgmr.msra.gmra.mrb[32].mxu1 %vm975_vm1, %v972_v31 }
 0x2d1   :  { %v1415_v36 = vpop.f32.mrb[16].mxu1 }
 0x2d2   :  { %v846_v38 = vadd.f32 %v1415_v36, %v1207_v35  ;;  %v837_v39 = vpop.f32.mrb[17].mxu1 }
 0x2d3   :  { %v838_v40 = vadd.f32 %v1207_v35, %v837_v39  ;;  %v1416_v41 = vpop.f32.mrb[18].mxu1 }
 0x2d4   :  { %v849_v42 = vadd.f32 %v1416_v41, %v1207_v35  ;;  %v840_v43 = vpop.f32.mrb[19].mxu1  ;;  %v902_v45 = vmax.f32 %v846_v38, 0.0  ;;  %v973_v38 = vld [vmem:[%s1935_s12] sm:$0xf] }
 0x2d5   :  { %v841_v44 = vadd.f32 %v1207_v35, %v840_v43  ;;  %v900_v47 = vmax.f32 %v838_v40, 0.0 }
 0x2d6   :  { %v903_v46 = vmax.f32 %v849_v42, 0.0 }
 0x2d7   :  { %v901_v48 = vmax.f32 %v841_v44, 0.0  ;;  %v1157_v44 = vpop.permute.xlu0 %1156 }
 0x2d8   :  { %v917_v49 = vpack.c.bf16 %v903_v46, %v902_v45 }
 0x2d9   :  { %v916_v50 = vpack.c.bf16 %v901_v48, %v900_v47  ;;  %v1419_v51 = vpop.f32.mrb[20].mxu1 }
 0x2da   :  { %v862_v52 = vadd.f32 %v1419_v51, %v1207_v35  ;;  %v853_v53 = vpop.f32.mrb[21].mxu1  ;;  %v983_v7 = vsel %vm975_vm1, %v917_v49, 0 }
 0x2db   :  { %v854_v54 = vadd.f32 %v1207_v35, %v853_v53  ;;  %v1420_v55 = vpop.f32.mrb[22].mxu1  ;;  %v980_v56 = vsel %vm975_vm1, %v916_v50, 0 }
 0x2dc   :  { %v865_v57 = vadd.f32 %v1420_v55, %v1207_v35  ;;  %v856_v58 = vpop.f32.mrb[23].mxu1  ;;  %1430 = vmatpush3.bf16.xpose.msra.mxu0 %v980_v56  ;;  %v906_v60 = vmax.f32 %v862_v52, 0.0 }
 0x2dd   :  { %v857_v59 = vadd.f32 %v1207_v35, %v856_v58  ;;  %1431 = vmatprep.subr.bf16.mxu0 %v1533_v37  ;;  %v904_v62 = vmax.f32 %v854_v54, 0.0 }
 0x2de   :  { %v907_v61 = vmax.f32 %v865_v57, 0.0 }
 0x2df   :  { %v905_v63 = vmax.f32 %v857_v59, 0.0 }
 0x2e0   :  { %v919_v0 = vpack.c.bf16 %v907_v61, %v906_v60 }
 0x2e1   :  { %v918_v1 = vpack.c.bf16 %v905_v63, %v904_v62  ;;  %v1423_v2 = vpop.f32.mrb[24].mxu1 }
 0x2e2   :  { %v878_v3 = vadd.f32 %v1423_v2, %v1207_v35  ;;  %v869_v4 = vpop.f32.mrb[25].mxu1  ;;  %v989_v32 = vsel %vm975_vm1, %v919_v0, 0 }
 0x2e3   :  { %v870_v5 = vadd.f32 %v1207_v35, %v869_v4  ;;  %v1424_v6 = vpop.f32.mrb[26].mxu1  ;;  %v986_v22 = vsel %vm975_vm1, %v918_v1, 0 }
 0x2e4   :  { %v881_v8 = vadd.f32 %v1424_v6, %v1207_v35  ;;  %v872_v9 = vpop.f32.mrb[27].mxu1  ;;  %1432 = vmatpush3.bf16.xpose.msra.mxu0 %v983_v7  ;;  %v910_v11 = vmax.f32 %v878_v3, 0.0 }
 0x2e5   :  { %v873_v10 = vadd.f32 %v1207_v35, %v872_v9  ;;  %1433 = vmatprep.subr.bf16.mxu0 %v1533_v37  ;;  %v908_v13 = vmax.f32 %v870_v5, 0.0 }
 0x2e6   :  { %v911_v12 = vmax.f32 %v881_v8, 0.0 }
 0x2e7   :  { %v909_v14 = vmax.f32 %v873_v10, 0.0 }
 0x2e8   :  { %v921_v15 = vpack.c.bf16 %v911_v12, %v910_v11 }
 0x2e9   :  { %v920_v16 = vpack.c.bf16 %v909_v14, %v908_v13  ;;  %v1427_v17 = vpop.f32.mrb[28].mxu1 }
 0x2ea   :  { %v894_v18 = vadd.f32 %v1427_v17, %v1207_v35  ;;  %v885_v19 = vpop.f32.mrb[29].mxu1  ;;  %v995_v34 = vsel %vm975_vm1, %v921_v15, 0 }
 0x2eb   :  { %v886_v20 = vadd.f32 %v1207_v35, %v885_v19  ;;  %v1428_v21 = vpop.f32.mrb[30].mxu1  ;;  %v992_v33 = vsel %vm975_vm1, %v920_v16, 0 }
 0x2ec   :  { %v897_v23 = vadd.f32 %v1428_v21, %v1207_v35  ;;  %v888_v24 = vpop.f32.mrb[31].mxu1  ;;  %1434 = vmatpush3.bf16.xpose.msra.mxu0 %v986_v22  ;;  %v914_v26 = vmax.f32 %v894_v18, 0.0 }
 0x2ed   :  { %v889_v25 = vadd.f32 %v1207_v35, %v888_v24  ;;  %1435 = vmatprep.subr.bf16.mxu0 %v1533_v37  ;;  %v912_v28 = vmax.f32 %v886_v20, 0.0 }
 0x2ee   :  { %v915_v27 = vmax.f32 %v897_v23, 0.0 }
 0x2ef   :  { %v913_v29 = vmax.f32 %v889_v25, 0.0 }
 0x2f0   :  { %v923_v30 = vpack.c.bf16 %v915_v27, %v914_v26 }
 0x2f1   :  { %v922_v31 = vpack.c.bf16 %v913_v29, %v912_v28 }
 0x2f2   :  { %v1001_v36 = vsel %vm975_vm1, %v923_v30, 0 }
 0x2f3   :  { %v998_v35 = vsel %vm975_vm1, %v922_v31, 0 }
 0x2f4   :  { %1436 = vmatpush3.bf16.xpose.msra.mxu0 %v989_v32 }
 0x2f5   :  { %1437 = vmatprep.subr.bf16.mxu0 %v1533_v37 }
 0x2fc   :  { %1438 = vmatpush3.bf16.xpose.msra.mxu0 %v992_v33 }
 0x2fd   :  { %1439 = vmatprep.subr.bf16.mxu0 %v1533_v37 }
 0x304   :  { %1440 = vmatpush3.bf16.xpose.msra.mxu0 %v995_v34 }
 0x305   :  { %1441 = vmatprep.subr.bf16.mxu0 %v1533_v37 }
 0x30c   :  { %1442 = vmatpush3.bf16.xpose.msra.mxu0 %v998_v35 }
 0x30d   :  { %1443 = vmatprep.subr.bf16.mxu0 %v1533_v37 }
 0x314   :  { %1444 = vmatpush3.bf16.xpose.msra.mxu0 %v1001_v36 }
 0x31b   :  { %1446 = vmatmul.mubr.msk.bf16.vlgmr.msra.gmra.mrb[16].mxu0 %vm975_vm1, %v973_v38 }
 0x323   :  { %v1144_v39 = vpop.f32.mrb[32].mxu1 }
 0x324   :  { %v1467_v40 = vpop.f32.mrb[33].mxu1 }
 0x325   :  { %v1147_v41 = vpop.f32.mrb[34].mxu1 }
 0x326   :  { %v1468_v42 = vpop.f32.mrb[35].mxu1 }
 0x3ee   :  { %v1037_v43 = vpop.f32.mrb[16].mxu0 }
 0x3ef   :  { %v1145_v45 = vadd.f32 %v1144_v39, %v1037_v43  ;;  %v1447_v46 = vpop.f32.mrb[17].mxu0 }
 0x3f0   :  { %v1040_v47 = vpop.f32.mrb[18].mxu0 }
 0x3f1   :  { %v1159_v48 = vadd.f32 %v1157_v44, %v1145_v45  ;;  %v1448_v37 = vpop.f32.mrb[19].mxu0 }
 0x3f3   :  { %1160 = vst [vmem:[%s1936_s14] sm:$0xff] %v1159_v48 }

</bundles_post_ra>
